<compile_context>
chip_gen: v6e
topology: v6e:2x2x1
jax: 0.10.0
libtpu: 0.0.40
codegen_flags: <defaults>
</compile_context>

<pallas_src>
import jax
import jax.numpy as jnp
from jax.experimental import pallas as pl
from jax.experimental.pallas import tpu as pltpu


def _vq1_kernel(q_ref, o_ref):
    q = q_ref[...]
    o_ref[...] = q * (q * 0.3164) + 0.5306


def _target_block_bytes():
    """Per-generation block-size target (bytes per buffer)."""
    kind = ""
    try:
        kind = jax.devices()[0].device_kind.lower()
    except Exception:
        pass
    if "v7" in kind:
        return 8 << 20          # 3.2 TB/s HBM: amortize ~0.35 us/step overhead
    if "v5 lite" in kind or "v5e" in kind:
        return 2 << 20          # already DMA-bound per step; keep VMEM small
    return 4 << 20              # v6e default / unknown


def vq1_forward(q, donate_input: bool = False):
    """Pallas TPU implementation of Vq_1.forward (elementwise)."""
    orig_shape = q.shape

    # Match torch promotion: int tensor * python float -> float32.
    if not jnp.issubdtype(q.dtype, jnp.floating):
        q = q.astype(jnp.float32)
    dtype = q.dtype
    n = q.size
    itemsize = jnp.dtype(dtype).itemsize

    # Choose the lane-dense inner width. Prefer >= 8 rows (full vreg tiles).
    widths = (4096, 2048, 1024, 512, 256, 128)
    width = None
    for w in widths:
        if n % w == 0 and (n // w) >= 8:
            width = w
            break
    if width is None:
        for w in widths:
            if n % w == 0:
                width = w
                break
    if width is None or n == 0:
        # Rare: size not a multiple of 128 lanes.  A plain XLA elementwise op
        # is already optimal (2 HBM passes) and avoids the old pad+slice
        # fallback's 2 extra passes.
        return (q * (q * 0.3164) + 0.5306).reshape(orig_shape)

    rows = n // width
    slab = q.reshape(rows, width)

    # Dtype-aware sublane alignment: f32->8, bf16/f16->16, int8/fp8->32.
    sub = {4: 8, 2: 16, 1: 32}.get(itemsize, 8)

    # Row-block size from the per-generation byte target.
    target_bytes = _target_block_bytes()
    br_target = max(sub, (target_bytes // (width * itemsize)) // sub * sub)

    if rows > br_target:
        block_rows = br_target
    else:
        # Small/medium tensor: still split into >= 2 blocks when possible so
        # both v7x TensorCores get work and DMA/compute overlap exists.
        half = -(-rows // 2)                    # ceil(rows / 2)
        block_rows = -(-half // sub) * sub      # round up to sublane multiple
        if block_rows >= rows:
            block_rows = rows                   # too small to split cleanly

    grid = (pl.cdiv(rows, block_rows),)         # trailing partial block is clipped

    call_kwargs = {}
    if donate_input:
        # Caller promises q is donated / not reused: reuse its HBM buffer.
        call_kwargs["input_output_aliases"] = {0: 0}

    out = pl.pallas_call(
        _vq1_kernel,
        out_shape=jax.ShapeDtypeStruct(slab.shape, dtype),
        grid=grid,
        in_specs=[pl.BlockSpec((block_rows, width), lambda i: (i, 0))],
        out_specs=pl.BlockSpec((block_rows, width), lambda i: (i, 0)),
        compiler_params=pltpu.CompilerParams(
            dimension_semantics=("parallel",),
            vmem_limit_bytes=48 * 1024 * 1024,
        ),
        cost_estimate=pl.CostEstimate(
            flops=2 * n, bytes_accessed=2 * n * itemsize, transcendentals=0),
        **call_kwargs,
    )(slab)

    return out.reshape(orig_shape)


if __name__ == "__main__":
    key = jax.random.PRNGKey(0)

    # Small NCHW input consistent with the module's forward.
    x = jax.random.normal(key, (2, 4, 16, 16), dtype=jnp.float32)
    y = vq1_forward(x)
    jax.block_until_ready(y)
    y_ref = x * (x * 0.3164) + 0.5306
    assert y.shape == x.shape and y.dtype == x.dtype
    assert jnp.allclose(y, y_ref, atol=1e-6, rtol=1e-6), "mismatch vs reference"

    # Larger input: exercises the >=2 grid-step (multi-block) path.
    x2 = jax.random.normal(jax.random.PRNGKey(1), (8, 4, 64, 128), dtype=jnp.float32)
    y2 = vq1_forward(x2)
    jax.block_until_ready(y2)
    y2_ref = x2 * (x2 * 0.3164) + 0.5306
    assert jnp.allclose(y2, y2_ref, atol=1e-6, rtol=1e-6), "mismatch (multi-block)"

    # Non-multiple-of-128 size: exercises the no-pad fallback path.
    x3 = jax.random.normal(jax.random.PRNGKey(2), (3, 5, 7), dtype=jnp.float32)
    y3 = vq1_forward(x3)
    jax.block_until_ready(y3)
    y3_ref = x3 * (x3 * 0.3164) + 0.5306
    assert jnp.allclose(y3, y3_ref, atol=1e-6, rtol=1e-6), "mismatch (remainder)"

    print("KERNEL_OK")
</pallas_src>

<mosaic_0001>
module attributes {stable_mosaic.version = 11 : i64} {
  func.func @_vq1_kernel(%arg0: i32, %arg1: memref<8x256xf32, #tpu.memory_space<vmem>>, %arg2: memref<8x256xf32, #tpu.memory_space<vmem>>) attributes {dimension_semantics = [#tpu.dimension_semantics<parallel>], iteration_bounds = array<i64: 1>, scalar_prefetch = 0 : i64, scratch_operands = 0 : i64, tpu.core_type = #tpu.core_type<tc>, window_params = [{transform_indices = @transform_0, window_bounds = array<i64: 8, 256>}, {transform_indices = @transform_1, window_bounds = array<i64: 8, 256>}]} {
    %c0 = arith.constant 0 : index
    %c0_0 = arith.constant 0 : index
    %0 = vector.load %arg1[%c0, %c0_0] : memref<8x256xf32, #tpu.memory_space<vmem>>, vector<8x256xf32>
    %cst = arith.constant 3.164000e-01 : f32
    %1 = vector.broadcast %cst : f32 to vector<8x256xf32>
    %2 = arith.mulf %0, %1 : vector<8x256xf32>
    %3 = arith.mulf %0, %2 : vector<8x256xf32>
    %cst_1 = arith.constant 5.306000e-01 : f32
    %4 = vector.broadcast %cst_1 : f32 to vector<8x256xf32>
    %5 = arith.addf %3, %4 : vector<8x256xf32>
    %c0_2 = arith.constant 0 : index
    %c0_3 = arith.constant 0 : index
    %6 = vector.load %arg2[%c0_2, %c0_3] : memref<8x256xf32, #tpu.memory_space<vmem>>, vector<8x256xf32>
    tpu.vector_store %arg2[%c0_2, %c0_3], %5 {strides = array<i32>} : memref<8x256xf32, #tpu.memory_space<vmem>>, vector<8x256xf32>,
    return
  }
  func.func @transform_0(%arg0: i32) -> (i32, i32) {
    %c0_i32 = arith.constant 0 : i32
    %c0_i32_0 = arith.constant 0 : i32
    return %arg0, %c0_i32 : i32, i32
  }
  func.func @transform_1(%arg0: i32) -> (i32, i32) {
    %c0_i32 = arith.constant 0 : i32
    %c0_i32_0 = arith.constant 0 : i32
    return %arg0, %c0_i32 : i32, i32
  }
}

</mosaic_0001>

<bundles_post_ra>
// kernel: tpu_custom_call.1
= control target key start
LH: loop header
LB: loop body
LE: loop exit
PB: predicated region body
PF: predicated region fallthrough
CT: control target
= control target key end

     0   :  { %6 = vsyncpa [#allocation3], 0  ;;  %s110_s0 = inlined_call_operand.hbm [shape: f32[8,256], index: 0, kind: input, shape index: {}]   ;;  %s111_s1 = inlined_call_operand.hbm [shape: f32[8,256], index: 1, kind: output, shape index: {}]  }
   0x1   :  { %7 = vsyncpa [#allocation4], 0  ;;  %s92_s6 = smov [#allocation2]  }
   0x2   :  { %s14_s7 = sshll.u32 %s92_s6, 4  ;;  %s15_s7 = int_to_ptr.vmem [resolvable:$true] %s14_s7 }
   0x3   :  { %s56_s8 = scalar_lea.vmem %s15_s7, 256  ;;  %p61_p1 = scmp.lt.s32.totalorder %s15_s7, %s15_s7 }
   0x4   :  { %p57_p0 = scmp.ne.s32.totalorder %s15_s7, %s56_s8  ;;  %p62_p2 = scmp.lt.s32.totalorder %s56_s8, %s56_s8 }
   0x6   :  { %p63_p3 = por %p62_p2, %p61_p1 }
   0x8   :  { %p64_p4 = pnand %p63_p3, %p57_p0 }
   0xa   :  { %67 = shalt.err (!%p64_p4)
}
   0xb   :  { %17 = dma.hbm_to_vmem [thread:$0]  %s110_s0, 256, %s15_s7, [#allocation3]  }
   0xc   :  { %88 = dma.done.wait [#allocation3], 256  }
   0xd   :  { %89 = vsyncadd [#allocation3], 4294967040  ;;  %v21_v0 = vld [vmem:[#allocation2] sm:$0xff]  ;;  %v22_v1 = vld [vmem:[#allocation2 + $0x8] sm:$0xff]  ;;  %s93_s11 = smov [#allocation5]  }
   0xe   :  { %v23_v2 = vmul.f32 0.3164, %v21_v0  ;;  %v24_v3 = vmul.f32 0.3164, %v22_v1  ;;  %s37_s12 = sshll.u32 %s93_s11, 4  ;;  %s38_s12 = int_to_ptr.vmem [resolvable:$true] %s37_s12 }
   0xf   :  { %s68_s13 = scalar_lea.vmem %s38_s12, 256  ;;  %p73_p6 = scmp.lt.s32.totalorder %s38_s12, %s38_s12 }
  0x10   :  { %v25_v4 = vmul.f32 %v23_v2, %v21_v0  ;;  %v26_v5 = vmul.f32 %v24_v3, %v22_v1  ;;  %p69_p5 = scmp.ne.s32.totalorder %s38_s12, %s68_s13  ;;  %p74_p7 = scmp.lt.s32.totalorder %s68_s13, %s68_s13 }
  0x12   :  { %v27_v6 = vadd.f32 0.5306, %v25_v4  ;;  %v28_v7 = vadd.f32 0.5306, %v26_v5  ;;  %p75_p8 = por %p74_p7, %p73_p6 }
  0x14   :  { %29 = vst [vmem:[#allocation5] sm:$0xff] %v27_v6  ;;  %30 = vst [vmem:[#allocation5 + $0x8] sm:$0xff] %v28_v7  ;;  %p76_p9 = pnand %p75_p8, %p69_p5 }
  0x16   :  { %79 = shalt.err (!%p76_p9)
}
  0x17   :  { %40 = dma.vmem_to_hbm [thread:$0]  %s38_s12, 256, %s111_s1, [#allocation4]  }
  0x18   :  { %90 = dma.done.wait [#allocation4], 256  }
  0x19   :  { %91 = vsyncadd [#allocation4], 4294967040 }
  0x1a   :  { %44 = vsyncpa [#allocation3], 1 }
  0x1b   :  { %45 = vsyncpa [#allocation4], 1 }

</bundles_post_ra>
